<compile_context>
chip_gen: v6e
topology: v6e:2x2x1
jax: 0.10.0
libtpu: 0.0.40
codegen_flags: <defaults>
</compile_context>

<pallas_src>
import functools

import jax
import jax.numpy as jnp
from jax.experimental import pallas as pl
from jax.experimental.pallas import tpu as pltpu


def _round_up(x, m):
    return (x + m - 1) // m * m


# ---------------------------------------------------------------------------
# Stage 1 / 3: row-tiled dense layer   out = x @ W + b
# ---------------------------------------------------------------------------
def _dense_kernel(x_ref, w_ref, b_ref, o_ref, *, mxu_dtype):
    def mx(t):  # cast only at the MXU boundary; accumulation stays f32
        return t if mxu_dtype is None else t.astype(mxu_dtype)

    acc = jnp.dot(mx(x_ref[...]), mx(w_ref[...]),
                  preferred_element_type=jnp.float32)
    o_ref[...] = (acc + b_ref[...]).astype(o_ref.dtype)


def _dense(x2d, w, b2d, *, out_dtype, mxu_dtype, row_tile):
    rows, cin = x2d.shape
    cout = w.shape[1]
    assert rows % row_tile == 0
    kernel = functools.partial(_dense_kernel, mxu_dtype=mxu_dtype)
    return pl.pallas_call(
        kernel,
        out_shape=jax.ShapeDtypeStruct((rows, cout), out_dtype),
        grid_spec=pltpu.PrefetchScalarGridSpec(
            num_scalar_prefetch=0,
            grid=(rows // row_tile,),
            in_specs=[
                pl.BlockSpec((row_tile, cin), lambda i: (i, 0)),  # x rows (pipelined)
                pl.BlockSpec((cin, cout), lambda i: (0, 0)),      # resident weights
                pl.BlockSpec((1, cout), lambda i: (0, 0)),        # resident bias
            ],
            out_specs=pl.BlockSpec((row_tile, cout), lambda i: (i, 0)),
        ),
        compiler_params=pltpu.CompilerParams(
            dimension_semantics=("parallel",)),
    )(x2d, w, b2d)


# ---------------------------------------------------------------------------
# Stage 2: flash attention, grid = (B*H, q_blocks, kv_blocks)
# ---------------------------------------------------------------------------
def _flash_attn_kernel(q_ref, k_ref, v_ref, o_ref, m_sc, l_sc, acc_sc):
    kv = pl.program_id(2)

    @pl.when(kv == 0)
    def _():
        m_sc[...] = jnp.full_like(m_sc, -jnp.inf)
        l_sc[...] = jnp.zeros_like(l_sc)
        acc_sc[...] = jnp.zeros_like(acc_sc)

    # Blocks are (1, tq, D) / (1, tkv, D); softmax scale is already folded into q.
    s = jnp.einsum('gqd,gkd->gqk', q_ref[...], k_ref[...],
                   preferred_element_type=jnp.float32)
    m_prev = m_sc[...]
    m_new = jnp.maximum(m_prev, jnp.max(s, axis=-1, keepdims=True))
    alpha = jnp.exp(m_prev - m_new)
    p = jnp.exp(s - m_new)
    l_sc[...] = alpha * l_sc[...] + jnp.sum(p, axis=-1, keepdims=True)
    acc_sc[...] = alpha * acc_sc[...] + jnp.einsum(
        'gqk,gkd->gqd', p.astype(v_ref.dtype), v_ref[...],
        preferred_element_type=jnp.float32)
    m_sc[...] = m_new

    @pl.when(kv == pl.num_programs(2) - 1)
    def _():
        # Exact divide (not approx reciprocal) for tight parity with torch softmax.
        o_ref[...] = (acc_sc[...] / l_sc[...]).astype(o_ref.dtype)


def _flash_attention(qh, kh, vh, *, tq, tkv, out_dtype):
    G, N, D = qh.shape
    assert N % tq == 0 and N % tkv == 0
    return pl.pallas_call(
        _flash_attn_kernel,
        out_shape=jax.ShapeDtypeStruct((G, N, D), out_dtype),
        grid_spec=pltpu.PrefetchScalarGridSpec(
            num_scalar_prefetch=0,
            grid=(G, N // tq, N // tkv),
            in_specs=[
                pl.BlockSpec((1, tq, D), lambda g, qi, ki: (g, qi, 0)),
                pl.BlockSpec((1, tkv, D), lambda g, qi, ki: (g, ki, 0)),
                pl.BlockSpec((1, tkv, D), lambda g, qi, ki: (g, ki, 0)),
            ],
            out_specs=pl.BlockSpec((1, tq, D), lambda g, qi, ki: (g, qi, 0)),
            scratch_shapes=[
                pltpu.VMEM((1, tq, 1), jnp.float32),   # running max
                pltpu.VMEM((1, tq, 1), jnp.float32),   # running denominator
                pltpu.VMEM((1, tq, D), jnp.float32),   # running numerator
            ],
        ),
        compiler_params=pltpu.CompilerParams(
            dimension_semantics=("parallel", "parallel", "arbitrary")),
    )(qh, kh, vh)


# ---------------------------------------------------------------------------
# Module wrapper
# ---------------------------------------------------------------------------
def attention_forward(x, w_qkv, w_proj, b_proj, *, num_heads,
                      mxu_dtype=jnp.bfloat16, row_tile=512):
    """Forward of the point_bert Attention module.

    x      : (B, N, C)
    w_qkv  : (C, 3C)  nn.Linear(dim, 3*dim, bias=False) weight, stored (in, out)
    w_proj : (C, C)   nn.Linear(dim, dim) weight, stored (in, out)
    b_proj : (C,)
    mxu_dtype: dtype fed to the MXU (None -> keep x.dtype).  Softmax and all
               accumulation stay f32 regardless.
    """
    B, N, C = x.shape
    H = num_heads
    assert C % H == 0
    D = C // H
    scale = D ** (-0.5)

    # ---- host-side (XLA) precision / layout plumbing ----------------------
    # Fold the softmax scale into the q columns of the fused qkv weight (free).
    w_qkv_s = jnp.concatenate([w_qkv[:, :C] * scale, w_qkv[:, C:]], axis=1)
    if mxu_dtype is not None:
        w_qkv_s = w_qkv_s.astype(mxu_dtype)
        w_proj_k = w_proj.astype(mxu_dtype)
    else:
        w_proj_k = w_proj
    inter_dtype = x.dtype if mxu_dtype is None else mxu_dtype

    b_qkv = jnp.zeros((1, 3 * C), jnp.float32)            # qkv_bias=False
    b_proj2d = b_proj.reshape(1, C).astype(jnp.float32)

    BN = B * N
    rt = min(row_tile, _round_up(BN, 8))
    BN_pad = _round_up(BN, rt)

    def pad_rows(a):
        return a if a.shape[0] == BN_pad else jnp.pad(
            a, ((0, BN_pad - a.shape[0]), (0, 0)))

    x_flat = pad_rows(x.reshape(BN, C))

    # ---- stage 1: fused qkv projection ------------------------------------
    qkv_flat = _dense(x_flat, w_qkv_s, b_qkv, out_dtype=inter_dtype,
                      mxu_dtype=mxu_dtype, row_tile=rt)

    # (BN, 3C) -> per-head (B*H, N, D), matching torch's
    # reshape(B, N, 3, H, D).permute(2, 0, 3, 1, 4).
    qkv = qkv_flat[:BN].reshape(B, N, 3, H, D)
    qkv = jnp.transpose(qkv, (2, 0, 3, 1, 4))              # (3, B, H, N, D)
    qh = qkv[0].reshape(B * H, N, D)
    kh = qkv[1].reshape(B * H, N, D)
    vh = qkv[2].reshape(B * H, N, D)

    # ---- stage 2: flash attention ------------------------------------------
    if N % 128 == 0:
        tq = tkv = 128
    else:
        # TODO(synk): pad/tile ragged N for production shapes; whole-N blocks
        # are fine (and exact) for small N.
        tq = tkv = N
    yh = _flash_attention(qh, kh, vh, tq=tq, tkv=tkv, out_dtype=inter_dtype)

    # (B*H, N, D) -> (BN, C), matching torch's .transpose(1, 2).reshape(B, N, C)
    y_flat = jnp.transpose(yh.reshape(B, H, N, D), (0, 2, 1, 3)).reshape(BN, C)

    # ---- stage 3: output projection (+ bias); proj_drop(p=0) is identity ---
    out_flat = _dense(pad_rows(y_flat), w_proj_k, b_proj2d, out_dtype=x.dtype,
                      mxu_dtype=mxu_dtype, row_tile=rt)

    return out_flat[:BN].reshape(B, N, C)


def _reference(x, w_qkv, w_proj, b_proj, *, num_heads):
    """Pure-JAX reference matching the PyTorch forward."""
    B, N, C = x.shape
    head_dim = C // num_heads
    scale = head_dim ** (-0.5)
    qkv = x @ w_qkv                                         # (B, N, 3C)
    qkv = qkv.reshape(B, N, 3, num_heads, head_dim)
    qkv = jnp.transpose(qkv, (2, 0, 3, 1, 4))               # (3, B, H, N, D)
    q, k, v = qkv[0], qkv[1], qkv[2]
    attn = jnp.einsum("bhnd,bhmd->bhnm", q, k) * scale
    attn = jax.nn.softmax(attn, axis=-1)
    y = jnp.einsum("bhnm,bhmd->bhnd", attn, v)              # (B, H, N, D)
    y = jnp.transpose(y, (0, 2, 1, 3)).reshape(B, N, C)
    return y @ w_proj + b_proj


if __name__ == "__main__":
    # Small shapes consistent with the module: dim=32, num_heads=8 -> head_dim=4.
    B, N, C = 2, 8, 32
    num_heads = 8

    key = jax.random.PRNGKey(0)
    kx, kqkv, kproj, kbias = jax.random.split(key, 4)

    x = jax.random.normal(kx, (B, N, C), dtype=jnp.float32)
    # Deterministic synthetic parameters (nn.Linear(dim, dim*3, bias=False),
    # nn.Linear(dim, dim)); stored as (in, out).
    w_qkv = jax.random.normal(kqkv, (C, 3 * C), dtype=jnp.float32) * 0.05
    w_proj = jax.random.normal(kproj, (C, C), dtype=jnp.float32) * 0.05
    b_proj = jax.random.normal(kbias, (C,), dtype=jnp.float32) * 0.05

    ref = _reference(x, w_qkv, w_proj, b_proj, num_heads=num_heads)

    # f32 MXU path: close parity with the torch/f32 reference.
    out_f32 = attention_forward(x, w_qkv, w_proj, b_proj,
                                num_heads=num_heads, mxu_dtype=None)
    out_f32 = jax.block_until_ready(out_f32)
    assert out_f32.shape == (B, N, C)
    assert jnp.allclose(out_f32, ref, atol=2e-3, rtol=2e-3), "f32 path mismatch"

    # Default (production) path: bf16 at the MXU boundary, f32 accumulation.
    out_bf16 = attention_forward(x, w_qkv, w_proj, b_proj, num_heads=num_heads)
    out_bf16 = jax.block_until_ready(out_bf16)
    assert out_bf16.shape == (B, N, C)
    assert jnp.allclose(out_bf16, ref, atol=3e-2, rtol=3e-2), "bf16 path mismatch"

    print("KERNEL_OK")
</pallas_src>

<mosaic_0001>
module attributes {stable_mosaic.version = 11 : i64} {
  func.func @_dense_kernel(%arg0: i32, %arg1: memref<16x32xf32, #tpu.memory_space<vmem>>, %arg2: memref<32x96xf32, #tpu.memory_space<vmem>>, %arg3: memref<1x96xf32, #tpu.memory_space<vmem>>, %arg4: memref<16x96xf32, #tpu.memory_space<vmem>>) attributes {dimension_semantics = [#tpu.dimension_semantics<parallel>], iteration_bounds = array<i64: 1>, scalar_prefetch = 0 : i64, scratch_operands = 0 : i64, tpu.core_type = #tpu.core_type<tc>, window_params = [{transform_indices = @transform_0, window_bounds = array<i64: 16, 32>}, {pipeline_mode = #tpu.pipeline_mode<synchronous>, transform_indices = @transform_1, window_bounds = array<i64: 32, 96>}, {pipeline_mode = #tpu.pipeline_mode<synchronous>, transform_indices = @transform_2, window_bounds = array<i64: 1, 96>}, {transform_indices = @transform_3, window_bounds = array<i64: 16, 96>}]} {
    %c0 = arith.constant 0 : index
    %c0_0 = arith.constant 0 : index
    %0 = vector.load %arg1[%c0, %c0_0] : memref<16x32xf32, #tpu.memory_space<vmem>>, vector<16x32xf32>
    %c0_1 = arith.constant 0 : index
    %c0_2 = arith.constant 0 : index
    %1 = vector.load %arg2[%c0_1, %c0_2] : memref<32x96xf32, #tpu.memory_space<vmem>>, vector<32x96xf32>
    %cst = arith.constant dense<0.000000e+00> : vector<16x96xf32>
    %2 = tpu.matmul %0, %1, %cst {dimension_numbers = #tpu.dot_dimension_numbers<[1], [0], [0], [1], [0, 0, 1, 1], [], []>} : vector<16x32xf32>, vector<32x96xf32>, vector<16x96xf32> -> vector<16x96xf32>
    %c0_3 = arith.constant 0 : index
    %c0_4 = arith.constant 0 : index
    %3 = vector.load %arg3[%c0_3, %c0_4] : memref<1x96xf32, #tpu.memory_space<vmem>>, vector<1x96xf32>
    %4 = vector.broadcast %3 : vector<1x96xf32> to vector<16x96xf32>
    %5 = arith.addf %2, %4 : vector<16x96xf32>
    %c0_5 = arith.constant 0 : index
    %c0_6 = arith.constant 0 : index
    %6 = vector.load %arg4[%c0_5, %c0_6] : memref<16x96xf32, #tpu.memory_space<vmem>>, vector<16x96xf32>
    tpu.vector_store %arg4[%c0_5, %c0_6], %5 {strides = array<i32>} : memref<16x96xf32, #tpu.memory_space<vmem>>, vector<16x96xf32>,
    return
  }
  func.func @transform_0(%arg0: i32) -> (i32, i32) {
    %c0_i32 = arith.constant 0 : i32
    %c0_i32_0 = arith.constant 0 : i32
    return %arg0, %c0_i32 : i32, i32
  }
  func.func @transform_1(%arg0: i32) -> (i32, i32) {
    %c0_i32 = arith.constant 0 : i32
    %c0_i32_0 = arith.constant 0 : i32
    %c0_i32_1 = arith.constant 0 : i32
    return %c0_i32, %c0_i32_0 : i32, i32
  }
  func.func @transform_2(%arg0: i32) -> (i32, i32) {
    %c0_i32 = arith.constant 0 : i32
    %c0_i32_0 = arith.constant 0 : i32
    %c0_i32_1 = arith.constant 0 : i32
    return %c0_i32, %c0_i32_0 : i32, i32
  }
  func.func @transform_3(%arg0: i32) -> (i32, i32) {
    %c0_i32 = arith.constant 0 : i32
    %c0_i32_0 = arith.constant 0 : i32
    return %arg0, %c0_i32 : i32, i32
  }
}

</mosaic_0001>

<bundles_post_ra>
// kernel: tpu_custom_call.1
= control target key start
LH: loop header
LB: loop body
LE: loop exit
PB: predicated region body
PF: predicated region fallthrough
CT: control target
= control target key end

     0   :  { %8 = vsyncpa [#allocation3], 0  ;;  %s298_s0 = inlined_call_operand.hbm [shape: f32[16,32], index: 0, kind: input, shape index: {}]   ;;  %s299_s1 = inlined_call_operand.hbm [shape: f32[32,96], index: 1, kind: input, shape index: {}]   ;;  %s300_s2 = inlined_call_operand.vmem [shape: f32[1,96], index: 2, kind: input, shape index: {}]   ;;  %s301_s3 = inlined_call_operand.hbm [shape: f32[16,96], index: 3, kind: output, shape index: {}]  }
   0x1   :  { %9 = vsyncpa [#allocation6], 0 }
   0x2   :  { %10 = vsyncpa [#allocation4], 0  ;;  %s250_s12 = smov [#allocation2]  }
   0x3   :  { %s16_s13 = sshll.u32 %s250_s12, 4  ;;  %s17_s13 = int_to_ptr.vmem [resolvable:$true] %s16_s13 }
   0x4   :  { %s192_s14 = scalar_lea.vmem %s17_s13, 256  ;;  %p197_p1 = scmp.lt.s32.totalorder %s17_s13, %s17_s13 }
   0x5   :  { %p193_p0 = scmp.ne.s32.totalorder %s17_s13, %s192_s14  ;;  %p198_p2 = scmp.lt.s32.totalorder %s192_s14, %s192_s14 }
   0x7   :  { %p199_p3 = por %p198_p2, %p197_p1 }
   0x9   :  { %p200_p4 = pnand %p199_p3, %p193_p0 }
   0xb   :  { %203 = shalt.err (!%p200_p4)
}
   0xc   :  { %s251_s15 = smov 128   ;;  %s252_s16 = smov 8  }
   0xd   :  { %22 = dma.hbm_to_vmem [thread:$0]  %s298_s0, 256, %s17_s13, [#allocation3], %s251_s15, %s251_s15, %s252_s16  }
   0xe   :  { %s253_s19 = smov [#allocation5]  }
   0xf   :  { %s28_s20 = sshll.u32 %s253_s19, 4  ;;  %s29_s20 = int_to_ptr.vmem [resolvable:$true] %s28_s20 }
  0x10   :  { %s212_s21 = scalar_lea.vmem %s29_s20, 512  ;;  %p217_p6 = scmp.lt.s32.totalorder %s29_s20, %s29_s20 }
  0x11   :  { %p213_p5 = scmp.ne.s32.totalorder %s29_s20, %s212_s21  ;;  %p218_p7 = scmp.lt.s32.totalorder %s212_s21, %s212_s21 }
  0x13   :  { %p219_p8 = por %p218_p7, %p217_p6 }
  0x15   :  { %p220_p9 = pnand %p219_p8, %p213_p5 }
  0x17   :  { %223 = shalt.err (!%p220_p9)
}
  0x18   :  { %34 = dma.hbm_to_vmem [thread:$0]  %s299_s1, 512, %s29_s20, [#allocation6], %s251_s15, %s251_s15, %s252_s16  }
  0x19   :  { %244 = dma.done.wait [#allocation3], 256  }
  0x1a   :  { %245 = vsyncadd [#allocation3], 4294967040 }
  0x1b   :  { %246 = dma.done.wait [#allocation6], 512  }
  0x1c   :  { %247 = vsyncadd [#allocation6], 4294966784  ;;  %vm56_vm0 = vcmask 261120   ;;  %v48_v0 = vld [vmem:[#allocation5 + $0x18] sm:$0xff]  ;;  %v47_v1 = vld [vmem:[#allocation5 + $0x10] sm:$0xff]  ;;  %vm138_vm1 = vcmask 785408  }
  0x1d   :  { %168 = vmatprep.subr.mxu0 %v48_v0  ;;  %v43_v2 = vld [vmem:[#allocation2] sm:$0xff]  ;;  %v46_v3 = vld [vmem:[#allocation5 + $0x8] sm:$0xff]  ;;  %v45_v4 = vld [vmem:[#allocation5] sm:$0xff]  ;;  %s254_s24 = smov [#allocation7]  }
  0x1e   :  { %169 = vmatpush3.msra.mxu0 %v48_v0  ;;  %176 = vmatprep.mubr.msk.f32.mxu0 %vm56_vm0, %v43_v2  ;;  %v44_v5 = vld [vmem:[#allocation2 + $0x8] sm:$0xff]  ;;  %v159_v6 = vld [vmem:[%s300_s2] ss:$0 sm:$0xff]  ;;  %s146_s25 = sshll.u32 %s254_s24, 4  ;;  %s147_s25 = int_to_ptr.vmem [resolvable:$true] %s146_s25 }
  0x1f   :  { %170 = vmatprep.subr.mxu0 %v47_v1  ;;  %s224_s26 = scalar_lea.vmem %s147_s25, 256  ;;  %p229_p11 = scmp.lt.s32.totalorder %s147_s25, %s147_s25 }
  0x20   :  { %171 = vmatpush3.msra.mxu0 %v47_v1  ;;  %p225_p10 = scmp.ne.s32.totalorder %s147_s25, %s224_s26  ;;  %p230_p12 = scmp.lt.s32.totalorder %s224_s26, %s224_s26 }
  0x21   :  { %172 = vmatprep.subr.mxu0 %v46_v3 }
  0x22   :  { %173 = vmatpush3.msra.mxu0 %v46_v3  ;;  %p231_p13 = por %p230_p12, %p229_p11 }
  0x23   :  { %174 = vmatprep.subr.mxu0 %v45_v4 }
  0x24   :  { %175 = vmatpush3.msra.mxu0 %v45_v4  ;;  %p232_p0 = pnand %p231_p13, %p225_p10 }
  0x25   :  { %177 = vmatmul.mubr.msk.f32.vlgmr.msra.gmra.mxu0 %vm56_vm0, %v44_v5 }
  0xe5   :  { %v178_v7 = vpop.f32.mrf.mxu0 }
  0xe6   :  { %v135_v8 = vadd.f32 %v178_v7, %v159_v6 }
  0xe7   :  { %v129_v9 = vpop.f32.mrf.mxu0 }
  0xe8   :  { %v130_v10 = vadd.f32 %v159_v6, %v129_v9  ;;  %140 = vst.msk [vmem:[#allocation7 + $0x8] sm:$0xff] %vm138_vm1, %v135_v8 }
  0xea   :  { %139 = vst.msk [vmem:[#allocation7] sm:$0xff] %vm138_vm1, %v130_v10 }
  0xeb   :  { %235 = shalt.err (!%p232_p0)
}
  0xec   :  { %152 = dma.vmem_to_hbm [thread:$0]  %s147_s25, 256, %s301_s3, [#allocation4], %s251_s15, %s251_s15, %s252_s16  }
  0xed   :  { %248 = dma.done.wait [#allocation4], 256  }
  0xee   :  { %249 = vsyncadd [#allocation4], 4294967040 }
  0xef   :  { %156 = vsyncpa [#allocation3], 1 }
  0xf0   :  { %157 = vsyncpa [#allocation6], 1 }
  0xf1   :  { %158 = vsyncpa [#allocation4], 1 }

</bundles_post_ra>
